<compile_context>
chip_gen: v6e
topology: v6e:2x2x1
jax: 0.10.0
libtpu: 0.0.40
codegen_flags: <defaults>
</compile_context>

<pallas_src>
import jax
import jax.numpy as jnp
from jax.experimental import pallas as pl
from jax.experimental.pallas import tpu as pltpu


# ---------------------------------------------------------------------------
# Hardware / tiling helpers
# ---------------------------------------------------------------------------
def _vmem_budget():
    """Returns (buffer_budget_bytes, vmem_limit_bytes) derived from the chip."""
    cap = 64 * 1024 * 1024                         # conservative default (v7x)
    try:
        info = pltpu.get_tpu_info()
        cap = int(getattr(info, "vmem_capacity_bytes", cap) or cap)
    except Exception:
        pass
    return int(cap * 0.70), int(cap * 0.75)


def _choose_tiles(N, H, W, S, Cs, Cp, in_isz, out_isz, budget, want_ts):
    """Pick (ts, tk, m).

    ts = 4*W*m is the flattened output-spatial tile (m x-rows == m output
    row-pairs), tk the Cs-reduction tile.  All tiles divide their axis exactly
    (no pad/slice) and satisfy the (8,128) BlockSpec rules.
    """
    # Spatial candidates: m divides H, lane-dense out/skip blocks, legal x block.
    m_cands = []
    for m in range(1, H + 1):
        if H % m:
            continue
        ts = 4 * W * m
        if not (m % 8 == 0 or m == H):            # x block (..., m, W) sublane rule
            continue
        if not (ts % 128 == 0 or ts == S):        # out/skip (..., ts) lane rule
            continue
        m_cands.append(m)
    if not m_cands:
        m_cands = [H]                             # full image rows: always legal
    small = [m for m in m_cands if 4 * W * m <= want_ts]
    m_cands = small or [min(m_cands)]

    # Reduction candidates: full Cs, or 128*2^k divisors of Cs.
    tk_cands = [Cs]
    tk = 128
    while tk < Cs:
        if Cs % tk == 0:
            tk_cands.append(tk)
        tk *= 2

    def cost(ts, tk):
        return (2 * tk * ts * in_isz              # skip tile (double-buffered)
                + 2 * Cp * (ts // 4) * in_isz     # small x tile
                + 2 * Cp * ts * out_isz           # output tile
                + Cp * ts * 4                     # f32 accumulator
                + 2 * Cp * tk * in_isz            # weight slab
                + 4 * Cp + 4096)                  # bias + slack

    feasible = [(4 * W * m, tk, m)
                for m in m_cands for tk in tk_cands
                if cost(4 * W * m, tk) <= budget]
    if not feasible:
        # TODO(synk): pathologically large single-image planes would need an
        # Element-indexed row tiling; divisor tiles always exist in practice.
        m = min(m_cands)
        feasible = [(4 * W * m, min(tk_cands), m)]

    # v7x megacore balance: with an odd batch prefer an even spatial step count.
    if N % 2 == 1:
        even = [c for c in feasible if (S // c[0]) % 2 == 0]
        if even:
            feasible = even

    return max(feasible, key=lambda c: (c[0], c[1]))   # largest ts, then tk


# ---------------------------------------------------------------------------
# Kernel
# ---------------------------------------------------------------------------
def _make_kernel(Cp, m, W, ts, fused):
    two_w = 2 * W

    def kernel(w_ref, b_ref, x_ref, skip_ref, o_ref, acc_ref):
        k = pl.program_id(2)

        @pl.when(k == 0)
        def _init():
            acc_ref[...] = jnp.zeros_like(acc_ref)

        # 1x1 conv: out[Cp, ts] += W[Cp, tk] @ skip[tk, ts]  (f32 MXU accumulation)
        acc_ref[...] += jnp.dot(w_ref[...], skip_ref[0],
                                preferred_element_type=jnp.float32)

        @pl.when(k == pl.num_programs(2) - 1)
        def _finalize():
            if fused:
                # Fused x2 nearest upsample of the small x tile, all in VMEM:
                #   (Cp, m, W) -> dup columns -> (Cp, m, 2W)
                #              -> dup rows    -> (Cp, m, 2, 2W) -> (Cp, ts)
                xt = x_ref[0].astype(jnp.float32)
                xc = jnp.broadcast_to(xt[:, :, :, None],
                                      (Cp, m, W, 2)).reshape(Cp, m, two_w)
                xu = jnp.broadcast_to(xc[:, :, None, :],
                                      (Cp, m, 2, two_w)).reshape(Cp, ts)
            else:
                xu = x_ref[0].astype(jnp.float32)        # pre-expanded (Cp, ts)
            o_ref[0] = (acc_ref[...] + b_ref[...] + xu).astype(o_ref.dtype)

    return kernel


def _fpn_pallas(x, *, skip_f, w2d, b2d, out_dtype, ts, tk, m, fused, vmem_limit):
    N = x.shape[0]
    Cp, Cs = w2d.shape
    S = skip_f.shape[-1]
    grid = (N, S // ts, Cs // tk)

    if fused:
        W = x.shape[-1]
        x_spec = pl.BlockSpec((1, Cp, m, W), lambda n, i, k: (n, 0, i, 0))
    else:
        W = 1
        x_spec = pl.BlockSpec((1, Cp, ts), lambda n, i, k: (n, 0, i))

    in_isz = jnp.dtype(skip_f.dtype).itemsize
    out_isz = jnp.dtype(out_dtype).itemsize
    flops = 2 * N * S * Cs * Cp + 3 * N * S * Cp
    bytes_accessed = int(skip_f.size * in_isz
                         + x.size * jnp.dtype(x.dtype).itemsize
                         + N * Cp * S * out_isz
                         + w2d.size * jnp.dtype(w2d.dtype).itemsize
                         + b2d.size * 4)

    return pl.pallas_call(
        _make_kernel(Cp, m, W, ts, fused),
        out_shape=jax.ShapeDtypeStruct((N, Cp, S), out_dtype),
        grid_spec=pltpu.PrefetchScalarGridSpec(
            num_scalar_prefetch=0,
            grid=grid,
            in_specs=[
                pl.BlockSpec((Cp, tk), lambda n, i, k: (0, k)),        # weight slab
                pl.BlockSpec((Cp, 1), lambda n, i, k: (0, 0)),         # bias (resident)
                x_spec,                                                # small x / x_up
                pl.BlockSpec((1, tk, ts), lambda n, i, k: (n, k, i)),  # skip slab
            ],
            out_specs=pl.BlockSpec((1, Cp, ts), lambda n, i, k: (n, 0, i)),
            scratch_shapes=[pltpu.VMEM((Cp, ts), jnp.float32)],
        ),
        compiler_params=pltpu.CompilerParams(
            dimension_semantics=("parallel", "parallel", "arbitrary"),
            vmem_limit_bytes=vmem_limit,
        ),
        cost_estimate=pl.CostEstimate(flops=flops, transcendentals=0,
                                      bytes_accessed=bytes_accessed),
    )(w2d, b2d, x, skip_f)


# ---------------------------------------------------------------------------
# Public wrapper
# ---------------------------------------------------------------------------
def fpn_block(x, skip, weight, bias, *, tile_s=4096,
              compute_dtype=jnp.bfloat16, fuse_upsample=True):
    """x:(N,Cp,H,W), skip:(N,Cs,2H,2W), weight:(Cp,Cs,1,1), bias:(Cp,)."""
    N, Cp, H, W = x.shape
    Ns, Cs, H2, W2 = skip.shape
    assert Ns == N and H2 == 2 * H and W2 == 2 * W
    S = H2 * W2
    out_dtype = x.dtype                       # output keeps the caller's dtype

    if compute_dtype is not None:
        x = x.astype(compute_dtype)
        skip = skip.astype(compute_dtype)
        weight = weight.astype(compute_dtype)

    skip_f = skip.reshape(N, Cs, S)           # free contiguous merge
    w2d = weight.reshape(Cp, Cs)
    b2d = bias.reshape(Cp, 1).astype(jnp.float32)

    budget, vmem_limit = _vmem_budget()
    in_isz = jnp.dtype(skip_f.dtype).itemsize
    out_isz = jnp.dtype(out_dtype).itemsize
    ts, tk, m = _choose_tiles(N, H, W, S, Cs, Cp, in_isz, out_isz, budget, tile_s)

    out_flat = None
    if fuse_upsample:
        # Preferred path: zero extra HBM traffic for x (fused in-VMEM upsample).
        # TODO(synk): drop the host-side fallback once the in-kernel
        # broadcast+reshape expand is guaranteed to lower on every generation.
        try:
            out_flat = _fpn_pallas(x, skip_f=skip_f, w2d=w2d, b2d=b2d,
                                   out_dtype=out_dtype, ts=ts, tk=tk, m=m,
                                   fused=True, vmem_limit=vmem_limit)
        except Exception:
            out_flat = None
    if out_flat is None:
        # Fallback: one fused XLA broadcast over the *small* x (costs one extra
        # HBM round trip for x_up, but always lowers).
        x_up = jnp.broadcast_to(x[:, :, :, None, :, None],
                                (N, Cp, H, 2, W, 2)).reshape(N, Cp, S)
        out_flat = _fpn_pallas(x_up, skip_f=skip_f, w2d=w2d, b2d=b2d,
                               out_dtype=out_dtype, ts=ts, tk=tk, m=m,
                               fused=False, vmem_limit=vmem_limit)

    return out_flat.reshape(N, Cp, H2, W2)


# ---------------------------------------------------------------------------
# Self-test
# ---------------------------------------------------------------------------
if __name__ == "__main__":
    # x is the coarse pyramid level; skip is the 2x-larger lateral feature map.
    N, Cp, Cs = 2, 8, 4
    H = W = 16                                 # x spatial; skip is 32x32

    key = jax.random.PRNGKey(0)
    kx, ks, kw, kb = jax.random.split(key, 4)
    x = jax.random.normal(kx, (N, Cp, H, W), dtype=jnp.float32)
    skip = jax.random.normal(ks, (N, Cs, 2 * H, 2 * W), dtype=jnp.float32)
    # Deterministic synthetic Conv2d(Cs, Cp, kernel_size=1) params.
    weight = jax.random.normal(kw, (Cp, Cs, 1, 1), dtype=jnp.float32) * 0.1
    bias = jax.random.normal(kb, (Cp,), dtype=jnp.float32) * 0.1

    # Pure-JAX reference (same math as the PyTorch module).
    x_up_ref = jnp.repeat(jnp.repeat(x, 2, axis=2), 2, axis=3)
    conv_ref = (
        jnp.einsum("nchw,oc->nohw", skip, weight.reshape(Cp, Cs),
                   precision=jax.lax.Precision.HIGHEST)
        + bias[None, :, None, None]
    )
    ref = x_up_ref + conv_ref

    # Full-precision streaming path (tight tolerance).
    out_f32 = jax.block_until_ready(
        fpn_block(x, skip, weight, bias, compute_dtype=None))
    assert out_f32.shape == (N, Cp, 2 * H, 2 * W)
    assert jnp.allclose(out_f32, ref, atol=1e-4, rtol=1e-4), float(
        jnp.max(jnp.abs(out_f32 - ref)))

    # Default bf16-streaming path (f32 accumulation; loose tolerance).
    out_bf16 = jax.block_until_ready(fpn_block(x, skip, weight, bias))
    assert out_bf16.shape == (N, Cp, 2 * H, 2 * W)
    assert jnp.allclose(out_bf16, ref, atol=5e-2, rtol=5e-2), float(
        jnp.max(jnp.abs(out_bf16 - ref)))

    print("KERNEL_OK")
</pallas_src>

<mosaic_0001>
module attributes {stable_mosaic.version = 11 : i64} {
  func.func @kernel(%arg0: i32, %arg1: i32, %arg2: i32, %arg3: memref<8x4xf32, #tpu.memory_space<vmem>>, %arg4: memref<8x1xf32, #tpu.memory_space<vmem>>, %arg5: memref<1x8x16x16xf32, #tpu.memory_space<vmem>>, %arg6: memref<1x4x1024xf32, #tpu.memory_space<vmem>>, %arg7: memref<1x8x1024xf32, #tpu.memory_space<vmem>>, %arg8: memref<8x1024xf32, #tpu.memory_space<vmem>>) attributes {dimension_semantics = [#tpu.dimension_semantics<parallel>, #tpu.dimension_semantics<parallel>, #tpu.dimension_semantics<arbitrary>], iteration_bounds = array<i64: 2, 1, 1>, scalar_prefetch = 0 : i64, scratch_operands = 1 : i64, tpu.core_type = #tpu.core_type<tc>, window_params = [{transform_indices = @transform_0, window_bounds = array<i64: 8, 4>}, {pipeline_mode = #tpu.pipeline_mode<synchronous>, transform_indices = @transform_1, window_bounds = array<i64: 8, 1>}, {transform_indices = @transform_2, window_bounds = array<i64: 1, 8, 16, 16>}, {transform_indices = @transform_3, window_bounds = array<i64: 1, 4, 1024>}, {transform_indices = @transform_4, window_bounds = array<i64: 1, 8, 1024>}]} {
    %c0_i32 = arith.constant 0 : i32
    %0 = arith.cmpi eq, %arg2, %c0_i32 : i32
    %1 = arith.extui %0 : i1 to i32
    %c0_i32_0 = arith.constant 0 : i32
    %2 = arith.cmpi ne, %1, %c0_i32_0 : i32
    scf.if %2 {
      %cst_11 = arith.constant 0.000000e+00 : f32
      %13 = vector.broadcast %cst_11 : f32 to vector<8x1024xf32>
      %c0_12 = arith.constant 0 : index
      %c0_13 = arith.constant 0 : index
      %14 = vector.load %arg8[%c0_12, %c0_13] : memref<8x1024xf32, #tpu.memory_space<vmem>>, vector<8x1024xf32>
      tpu.vector_store %arg8[%c0_12, %c0_13], %13 {strides = array<i32>} : memref<8x1024xf32, #tpu.memory_space<vmem>>, vector<8x1024xf32>,
    } else {
    }
    %c0 = arith.constant 0 : index
    %c0_1 = arith.constant 0 : index
    %3 = vector.load %arg8[%c0, %c0_1] : memref<8x1024xf32, #tpu.memory_space<vmem>>, vector<8x1024xf32>
    %c0_2 = arith.constant 0 : index
    %c0_3 = arith.constant 0 : index
    %4 = vector.load %arg3[%c0_2, %c0_3] : memref<8x4xf32, #tpu.memory_space<vmem>>, vector<8x4xf32>
    %c0_4 = arith.constant 0 : index
    %c0_5 = arith.constant 0 : index
    %c0_6 = arith.constant 0 : index
    %5 = vector.load %arg6[%c0_4, %c0_5, %c0_6] : memref<1x4x1024xf32, #tpu.memory_space<vmem>>, vector<1x4x1024xf32>
    %6 = vector.shape_cast %5 : vector<1x4x1024xf32> to vector<4x1024xf32>
    %cst = arith.constant dense<0.000000e+00> : vector<8x1024xf32>
    %7 = tpu.matmul %4, %6, %cst {dimension_numbers = #tpu.dot_dimension_numbers<[1], [0], [0], [1], [0, 0, 1, 1], [], []>} : vector<8x4xf32>, vector<4x1024xf32>, vector<8x1024xf32> -> vector<8x1024xf32>
    %8 = arith.addf %3, %7 : vector<8x1024xf32>
    %c0_7 = arith.constant 0 : index
    %c0_8 = arith.constant 0 : index
    %9 = vector.load %arg8[%c0_7, %c0_8] : memref<8x1024xf32, #tpu.memory_space<vmem>>, vector<8x1024xf32>
    tpu.vector_store %arg8[%c0_7, %c0_8], %8 {strides = array<i32>} : memref<8x1024xf32, #tpu.memory_space<vmem>>, vector<8x1024xf32>,
    %c0_i32_9 = arith.constant 0 : i32
    %10 = arith.cmpi eq, %arg2, %c0_i32_9 : i32
    %11 = arith.extui %10 : i1 to i32
    %c0_i32_10 = arith.constant 0 : i32
    %12 = arith.cmpi ne, %11, %c0_i32_10 : i32
    scf.if %12 {
      %c0_11 = arith.constant 0 : index
      %c0_12 = arith.constant 0 : index
      %c0_13 = arith.constant 0 : index
      %c0_14 = arith.constant 0 : index
      %13 = vector.load %arg5[%c0_11, %c0_12, %c0_13, %c0_14] : memref<1x8x16x16xf32, #tpu.memory_space<vmem>>, vector<1x8x16x16xf32>
      %14 = vector.shape_cast %13 : vector<1x8x16x16xf32> to vector<8x16x16xf32>
      %15 = vector.shape_cast %14 : vector<8x16x16xf32> to vector<8x16x16x1xf32>
      %16 = vector.shape_cast %15 : vector<8x16x16x1xf32> to vector<8x16x16x1xf32>
      %17 = vector.broadcast %16 : vector<8x16x16x1xf32> to vector<8x16x16x2xf32>
      %18 = vector.shape_cast %17 : vector<8x16x16x2xf32> to vector<8x16x32xf32>
      %19 = vector.shape_cast %18 : vector<8x16x32xf32> to vector<8x16x1x32xf32>
      %20 = vector.shape_cast %19 : vector<8x16x1x32xf32> to vector<8x16x1x32xf32>
      %21 = vector.broadcast %20 : vector<8x16x1x32xf32> to vector<8x16x2x32xf32>
      %22 = vector.shape_cast %21 : vector<8x16x2x32xf32> to vector<8x1024xf32>
      %c0_15 = arith.constant 0 : index
      %c0_16 = arith.constant 0 : index
      %23 = vector.load %arg8[%c0_15, %c0_16] : memref<8x1024xf32, #tpu.memory_space<vmem>>, vector<8x1024xf32>
      %c0_17 = arith.constant 0 : index
      %c0_18 = arith.constant 0 : index
      %24 = vector.load %arg4[%c0_17, %c0_18] : memref<8x1xf32, #tpu.memory_space<vmem>>, vector<8x1xf32>
      %25 = vector.broadcast %24 : vector<8x1xf32> to vector<8x1024xf32>
      %26 = arith.addf %23, %25 : vector<8x1024xf32>
      %27 = arith.addf %26, %22 : vector<8x1024xf32>
      %c0_19 = arith.constant 0 : index
      %c0_20 = arith.constant 0 : index
      %c0_21 = arith.constant 0 : index
      %28 = vector.load %arg7[%c0_19, %c0_20, %c0_21] : memref<1x8x1024xf32, #tpu.memory_space<vmem>>, vector<1x8x1024xf32>
      %29 = vector.shape_cast %28 : vector<1x8x1024xf32> to vector<8x1024xf32>
      %30 = vector.shape_cast %27 : vector<8x1024xf32> to vector<1x8x1024xf32>
      tpu.vector_store %arg7[%c0_19, %c0_20, %c0_21], %30 {strides = array<i32>} : memref<1x8x1024xf32, #tpu.memory_space<vmem>>, vector<1x8x1024xf32>,
    } else {
    }
    return
  }
  func.func @transform_0(%arg0: i32, %arg1: i32, %arg2: i32) -> (i32, i32) {
    %c0_i32 = arith.constant 0 : i32
    %c0_i32_0 = arith.constant 0 : i32
    return %c0_i32, %arg2 : i32, i32
  }
  func.func @transform_1(%arg0: i32, %arg1: i32, %arg2: i32) -> (i32, i32) {
    %c0_i32 = arith.constant 0 : i32
    %c0_i32_0 = arith.constant 0 : i32
    %c0_i32_1 = arith.constant 0 : i32
    return %c0_i32, %c0_i32_0 : i32, i32
  }
  func.func @transform_2(%arg0: i32, %arg1: i32, %arg2: i32) -> (i32, i32, i32, i32) {
    %c0_i32 = arith.constant 0 : i32
    %c0_i32_0 = arith.constant 0 : i32
    %c0_i32_1 = arith.constant 0 : i32
    return %arg0, %c0_i32, %arg1, %c0_i32_0 : i32, i32, i32, i32
  }
  func.func @transform_3(%arg0: i32, %arg1: i32, %arg2: i32) -> (i32, i32, i32) {
    %c0_i32 = arith.constant 0 : i32
    return %arg0, %arg2, %arg1 : i32, i32, i32
  }
  func.func @transform_4(%arg0: i32, %arg1: i32, %arg2: i32) -> (i32, i32, i32) {
    %c0_i32 = arith.constant 0 : i32
    %c0_i32_0 = arith.constant 0 : i32
    return %arg0, %c0_i32, %arg1 : i32, i32, i32
  }
}

module attributes {stable_mosaic.version = 11 : i64} {
  func.func @kernel(%arg0: i32, %arg1: i32, %arg2: i32, %arg3: memref<8x4xf32, #tpu.memory_space<vmem>>, %arg4: memref<8x1xf32, #tpu.memory_space<vmem>>, %arg5: memref<1x8x1024xf32, #tpu.memory_space<vmem>>, %arg6: memref<1x4x1024xf32, #tpu.memory_space<vmem>>, %arg7: memref<1x8x1024xf32, #tpu.memory_space<vmem>>, %arg8: memref<8x1024xf32, #tpu.memory_space<vmem>>) attributes {dimension_semantics = [#tpu.dimension_semantics<parallel>, #tpu.dimension_semantics<parallel>, #tpu.dimension_semantics<arbitrary>], iteration_bounds = array<i64: 2, 1, 1>, scalar_prefetch = 0 : i64, scratch_operands = 1 : i64, tpu.core_type = #tpu.core_type<tc>, window_params = [{transform_indices = @transform_0, window_bounds = array<i64: 8, 4>}, {pipeline_mode = #tpu.pipeline_mode<synchronous>, transform_indices = @transform_1, window_bounds = array<i64: 8, 1>}, {transform_indices = @transform_2, window_bounds = array<i64: 1, 8, 1024>}, {transform_indices = @transform_3, window_bounds = array<i64: 1, 4, 1024>}, {transform_indices = @transform_4, window_bounds = array<i64: 1, 8, 1024>}]} {
    %c0_i32 = arith.constant 0 : i32
    %0 = arith.cmpi eq, %arg2, %c0_i32 : i32
    %1 = arith.extui %0 : i1 to i32
    %c0_i32_0 = arith.constant 0 : i32
    %2 = arith.cmpi ne, %1, %c0_i32_0 : i32
    scf.if %2 {
      %cst_11 = arith.constant 0.000000e+00 : f32
      %13 = vector.broadcast %cst_11 : f32 to vector<8x1024xf32>
      %c0_12 = arith.constant 0 : index
      %c0_13 = arith.constant 0 : index
      %14 = vector.load %arg8[%c0_12, %c0_13] : memref<8x1024xf32, #tpu.memory_space<vmem>>, vector<8x1024xf32>
      tpu.vector_store %arg8[%c0_12, %c0_13], %13 {strides = array<i32>} : memref<8x1024xf32, #tpu.memory_space<vmem>>, vector<8x1024xf32>,
    } else {
    }
    %c0 = arith.constant 0 : index
    %c0_1 = arith.constant 0 : index
    %3 = vector.load %arg8[%c0, %c0_1] : memref<8x1024xf32, #tpu.memory_space<vmem>>, vector<8x1024xf32>
    %c0_2 = arith.constant 0 : index
    %c0_3 = arith.constant 0 : index
    %4 = vector.load %arg3[%c0_2, %c0_3] : memref<8x4xf32, #tpu.memory_space<vmem>>, vector<8x4xf32>
    %c0_4 = arith.constant 0 : index
    %c0_5 = arith.constant 0 : index
    %c0_6 = arith.constant 0 : index
    %5 = vector.load %arg6[%c0_4, %c0_5, %c0_6] : memref<1x4x1024xf32, #tpu.memory_space<vmem>>, vector<1x4x1024xf32>
    %6 = vector.shape_cast %5 : vector<1x4x1024xf32> to vector<4x1024xf32>
    %cst = arith.constant dense<0.000000e+00> : vector<8x1024xf32>
    %7 = tpu.matmul %4, %6, %cst {dimension_numbers = #tpu.dot_dimension_numbers<[1], [0], [0], [1], [0, 0, 1, 1], [], []>} : vector<8x4xf32>, vector<4x1024xf32>, vector<8x1024xf32> -> vector<8x1024xf32>
    %8 = arith.addf %3, %7 : vector<8x1024xf32>
    %c0_7 = arith.constant 0 : index
    %c0_8 = arith.constant 0 : index
    %9 = vector.load %arg8[%c0_7, %c0_8] : memref<8x1024xf32, #tpu.memory_space<vmem>>, vector<8x1024xf32>
    tpu.vector_store %arg8[%c0_7, %c0_8], %8 {strides = array<i32>} : memref<8x1024xf32, #tpu.memory_space<vmem>>, vector<8x1024xf32>,
    %c0_i32_9 = arith.constant 0 : i32
    %10 = arith.cmpi eq, %arg2, %c0_i32_9 : i32
    %11 = arith.extui %10 : i1 to i32
    %c0_i32_10 = arith.constant 0 : i32
    %12 = arith.cmpi ne, %11, %c0_i32_10 : i32
    scf.if %12 {
      %c0_11 = arith.constant 0 : index
      %c0_12 = arith.constant 0 : index
      %c0_13 = arith.constant 0 : index
      %13 = vector.load %arg5[%c0_11, %c0_12, %c0_13] : memref<1x8x1024xf32, #tpu.memory_space<vmem>>, vector<1x8x1024xf32>
      %14 = vector.shape_cast %13 : vector<1x8x1024xf32> to vector<8x1024xf32>
      %c0_14 = arith.constant 0 : index
      %c0_15 = arith.constant 0 : index
      %15 = vector.load %arg8[%c0_14, %c0_15] : memref<8x1024xf32, #tpu.memory_space<vmem>>, vector<8x1024xf32>
      %c0_16 = arith.constant 0 : index
      %c0_17 = arith.constant 0 : index
      %16 = vector.load %arg4[%c0_16, %c0_17] : memref<8x1xf32, #tpu.memory_space<vmem>>, vector<8x1xf32>
      %17 = vector.broadcast %16 : vector<8x1xf32> to vector<8x1024xf32>
      %18 = arith.addf %15, %17 : vector<8x1024xf32>
      %19 = arith.addf %18, %14 : vector<8x1024xf32>
      %c0_18 = arith.constant 0 : index
      %c0_19 = arith.constant 0 : index
      %c0_20 = arith.constant 0 : index
      %20 = vector.load %arg7[%c0_18, %c0_19, %c0_20] : memref<1x8x1024xf32, #tpu.memory_space<vmem>>, vector<1x8x1024xf32>
      %21 = vector.shape_cast %20 : vector<1x8x1024xf32> to vector<8x1024xf32>
      %22 = vector.shape_cast %19 : vector<8x1024xf32> to vector<1x8x1024xf32>
      tpu.vector_store %arg7[%c0_18, %c0_19, %c0_20], %22 {strides = array<i32>} : memref<1x8x1024xf32, #tpu.memory_space<vmem>>, vector<1x8x1024xf32>,
    } else {
    }
    return
  }
  func.func @transform_0(%arg0: i32, %arg1: i32, %arg2: i32) -> (i32, i32) {
    %c0_i32 = arith.constant 0 : i32
    %c0_i32_0 = arith.constant 0 : i32
    return %c0_i32, %arg2 : i32, i32
  }
  func.func @transform_1(%arg0: i32, %arg1: i32, %arg2: i32) -> (i32, i32) {
    %c0_i32 = arith.constant 0 : i32
    %c0_i32_0 = arith.constant 0 : i32
    %c0_i32_1 = arith.constant 0 : i32
    return %c0_i32, %c0_i32_0 : i32, i32
  }
  func.func @transform_2(%arg0: i32, %arg1: i32, %arg2: i32) -> (i32, i32, i32) {
    %c0_i32 = arith.constant 0 : i32
    %c0_i32_0 = arith.constant 0 : i32
    return %arg0, %c0_i32, %arg1 : i32, i32, i32
  }
  func.func @transform_3(%arg0: i32, %arg1: i32, %arg2: i32) -> (i32, i32, i32) {
    %c0_i32 = arith.constant 0 : i32
    return %arg0, %arg2, %arg1 : i32, i32, i32
  }
  func.func @transform_4(%arg0: i32, %arg1: i32, %arg2: i32) -> (i32, i32, i32) {
    %c0_i32 = arith.constant 0 : i32
    %c0_i32_0 = arith.constant 0 : i32
    return %arg0, %c0_i32, %arg1 : i32, i32, i32
  }
}

</mosaic_0001>

<bundles_post_ra>
// kernel: tpu_custom_call.1
= control target key start
LH: loop header
LB: loop body
LE: loop exit
PB: predicated region body
PF: predicated region fallthrough
CT: control target
= control target key end

     0   :  { %9 = vsyncpa [#allocation4], 0  ;;  %s1338_s0 = inlined_call_operand.vmem [shape: f32[8,4], index: 0, kind: input, shape index: {}]   ;;  %s1339_s1 = inlined_call_operand.vmem [shape: f32[8,1], index: 1, kind: input, shape index: {}]   ;;  %s1340_s2 = inlined_call_operand.hbm [shape: f32[2,8,1024], index: 2, kind: input, shape index: {}]   ;;  %s1341_s3 = inlined_call_operand.hbm [shape: f32[2,4,1024], index: 3, kind: input, shape index: {}]   ;;  %s1342_s4 = inlined_call_operand.hbm [shape: f32[2,8,1024], index: 4, kind: output, shape index: {}]  }
   0x1   :  { %11 = vsyncpa [#allocation4 + $0x1], 0 }
   0x2   :  { %12 = vsyncpa [#allocation7], 0 }
   0x3   :  { %14 = vsyncpa [#allocation7 + $0x1], 0 }
   0x4   :  { %15 = vsyncpa [#allocation5], 0 }
   0x5   :  { %17 = vsyncpa [#allocation5 + $0x1], 0  ;;  %s1136_s15 = smov 0   ;;  %s1138_s16 = smov 0  }
   0x6   :  { %s1140_s17 = smov 0   ;;  %s1142_s18 = smov 0  }
   0x7   :  { %s1144_s19 = smov 0   ;;  %s1146_s20 = smov 0  }
   0x8 LB: > { %s855_s21 = sadd.s32 4294967295, %s1104_s20   ;;  %s856_s22 = sadd.s32 4294967294, %s1104_s20   ;;  %s1104_s20 = sphi %s1146_s20, %s23_s20   ;;  %s1100_s19 = sphi %s1144_s19, %s1354_s19   ;;  %s1096_s18 = sphi %s1142_s18, %s1353_s18   ;;  %s1092_s17 = sphi %s1140_s17, %s1352_s17   ;;  %s1088_s16 = sphi %s1138_s16, %s1351_s16   ;;  %s1084_s15 = sphi %s1136_s15, %s1350_s15  }
   0x9   : > { %s42_s23 = sadd.s32 1, %s1100_s19  ;;  %s98_s24 = sadd.s32 1, %s1092_s17 }
   0xa   : > { %p44_p0 = scmp.ge.s32.totalorder %s42_s23, 2  ;;  %p105_p1 = scmp.ne.s32.totalorder %s1092_s17, %s1088_s16 }
   0xb   : > { %p106_p2 = scmp.eq.s32.totalorder %s1104_s20, 0  ;;  %p111_p3 = scmp.ne.s32.totalorder %s1088_s16, %s1084_s15 }
   0xc   : > { %s1356_s23 = smov (%p44_p0, %s42_s23), 0  ;;  %p112_p5 = scmp.eq.s32.totalorder %s855_s21, 0 }
   0xd   : > { %p1177_p4 = por %p106_p2, %p105_p1  ;;  %s93_s26 = ssub.s32 %s1100_s19, %s1356_s23 }
   0xe   : > { %p167_p6 = scmp.eq.s32.totalorder %s855_s21, 1  ;;  %p96_p7 = scmp.eq.s32.totalorder %s93_s26, 0 }
   0xf   : > { %p1183_p8 = por %p112_p5, %p111_p3  ;;  %p173_p10 = scmp.eq.s32.totalorder %s856_s22, 1 }
  0x10   : > { %p1187_p9 = por %p167_p6, %p105_p1  ;;  %p907_p13 = scmp.lt.s32.totalorder %s1104_s20, 2 }
  0x11   : > { %s1192_s29 = scalar_select %p96_p7, %s1092_s17, %s98_s24  }
  0x12   : > { %p1194_p11 = por %p173_p10, %p111_p3  ;;  %s1201_s5 = sand.u32 1, %s1092_s17  }
  0x13   : > { %s860_s6 = sshll.u32 %s1201_s5, 6  ;;  %s887_s7 = sshll.u32 %s1100_s19, 10 }
  0x14   : > { %s215_s10 = scalar_lea.hbm %s1340_s2, %s887_s7  ;;  %s207_s11 = scalar_lea.vmem [#allocation3], %s860_s6 }
  0x15   : > { %s217_s12 = sshll.u32 %s207_s11, 4  ;;  %p1210_p0 = pnand %p907_p13, %p1177_p4  ;;  %s218_s12 = int_to_ptr.vmem [resolvable:$true] %s217_s12 }
  0x16   : > { %p866_p1 = scmp.ge.s32.totalorder %s1104_s20, 1  ;;  %p245_p2 = scmp.lt.s32.totalorder %s1104_s20, 3 }
  0x17   : > { %s204_s14 = scalar_lea.sflag [#allocation4], %s1201_s5  ;;  %p966_p3 = pneg %p1210_p0 }
  0x18   : > { %s977_s21 = scalar_lea.vmem %s218_s12, 1024  ;;  %s1106_s22 = smov [#allocation3]  }
  0x19   : > { %p978_p5 = scmp.ne.s32.totalorder %s218_s12, %s977_s21  ;;  %s982_s24 = sshll.u32 %s1106_s22, 4  ;;  %s983_s24 = int_to_ptr.vmem [resolvable:$false] %s982_s24 }
  0x1a   : > { %s984_s25 = scalar_lea.vmem %s983_s24, 2048  ;;  %p985_p4 = scmp.lt.s32.totalorder %s218_s12, %s983_s24 }
  0x1b   : > { %p980_p6 = pnand %p978_p5, %p966_p3  ;;  %p986_p10 = scmp.lt.s32.totalorder %s984_s25, %s977_s21 }
  0x1d   : > { %p981_p7 = pneg %p980_p6  ;;  %p987_p13 = por %p986_p10, %p985_p4 }
  0x1f   : > { %p988_p12 = pnand %p987_p13, %p981_p7 }
  0x21   : > { %991 = shalt.err (!%p988_p12)
}
  0x22   : > { %899 = dma.hbm_to_vmem [thread:$0]  (!%p1210_p0), %s215_s10, 1024, %s218_s12, %s204_s14  }
  0x23   : > { %p1228_p5 = pnand %p866_p1, %p245_p2  ;;  %s863_s6 = sshll.u32 %s1201_s5, 5 }
  0x24   : > { %s888_s7 = sshll.u32 %s1100_s19, 9  ;;  %s228_s21 = scalar_lea.vmem [#allocation6], %s863_s6 }
  0x25   : > { %s238_s11 = scalar_lea.hbm %s1341_s3, %s888_s7  ;;  %s240_s22 = sshll.u32 %s228_s21, 4  ;;  %s241_s22 = int_to_ptr.vmem [resolvable:$true] %s240_s22 }
  0x26   : > { %s225_s24 = scalar_lea.sflag [#allocation7], %s1201_s5  ;;  %s1005_s25 = scalar_lea.vmem %s241_s22, 512 }
  0x27   : > { %p1006_p12 = scmp.ne.s32.totalorder %s241_s22, %s1005_s25  ;;  %s1107_s10 = smov [#allocation6]  }
  0x28   : > { %s1010_s12 = sshll.u32 %s1107_s10, 4  ;;  %s1011_s12 = int_to_ptr.vmem [resolvable:$false] %s1010_s12 }
  0x29   : > { %p1008_p6 = pnand %p1006_p12, %p966_p3  ;;  %s1012_s14 = scalar_lea.vmem %s1011_s12, 1024 }
  0x2a   : > { %p1013_p1 = scmp.lt.s32.totalorder %s241_s22, %s1011_s12  ;;  %p1014_p2 = scmp.lt.s32.totalorder %s1012_s14, %s1005_s25 }
  0x2b   : > { %p1009_p7 = pneg %p1008_p6 }
  0x2c   : > { %p1015_p4 = por %p1014_p2, %p1013_p1 }
  0x2e   : > { %p1016_p10 = pnand %p1015_p4, %p1009_p7 }
  0x30   : > { %1019 = shalt.err (!%p1016_p10)
}
  0x31   : > { %902 = dma.hbm_to_vmem [thread:$0]  (!%p1210_p0), %s238_s11, 512, %s241_s22, %s225_s24  }
  0x32   : > { %249 = sbr.rel (%p1228_p5) target bundleno = 281 (0x119), region = 36  ;;  %s1246_s5 = sand.u32 (!%p1228_p5), 1, %s1088_s16  }
  0x33   : > { %s867_s6 = sshll.u32 (!%p1228_p5), %s1246_s5, 6  ;;  %s252_s7 = scalar_lea.sflag (!%p1228_p5), [#allocation4], %s1246_s5 }
  0x34   : > { %s1252_s8 = scalar_lea.vmem (!%p1228_p5), [#allocation3], %s867_s6 }
  0x37   : > { %1071 = dma.done.wait (%p1183_p8), %s252_s7, 1024  }
  0x38   : > { %1073 = vsyncadd (%p1183_p8), %s252_s7, 4294966272  ;;  %s868_s13 = sshll.u32 %s1246_s5, 5  ;;  %s261_s26 = scalar_lea.sflag [#allocation7], %s1246_s5 }
  0x39   : > { %s264_s9 = scalar_lea.vmem [#allocation6], %s868_s13 }
  0x3a   : > { %1075 = dma.done.wait (%p1183_p8), %s261_s26, 512  }
  0x3b   : > { %1077 = vsyncadd (%p1183_p8), %s261_s26, 4294966784  ;;  %v1108_v0 = vmov 0.0   ;;  %v1109_v1 = vmov 0   ;;  %v326_v2 = vld [vmem:[%s264_s9] sm:$0xff]  ;;  %vm342_vm0 = vcmask 1043456   ;;  %v327_v3 = vld [vmem:[%s264_s9 + $0x8] sm:$0xff] }
  0x3c   : > { %423 = vmatprep.mubr.f32.mxu0 %v1108_v0  ;;  %494 = vmatprep.mubr.f32.mxu1 %v1108_v0  ;;  %v334_v4 = vcombine.high %v326_v2, %v326_v2  ;;  %v335_v5 = vcombine.high %v327_v3, %v327_v3  ;;  %v328_v6 = vld [vmem:[%s264_s9 + $0x10] sm:$0xff]  ;;  %v329_v7 = vld [vmem:[%s264_s9 + $0x18] sm:$0xff]  ;;  %v678_v8 = vld [vmem:[%s1339_s1] sm:$0xff]  ;;  %vm338_vm1 = vcmask 31744   ;;  %s297_s27 = scalar_lea.vmem [#allocation8], %s867_s6  ;;  %s889_s25 = sshll.u32 %s1096_s18, 10 }
  0x3d   : > { %959 = vset.pattern.permute.xlu0 %v1109_v1  ;;  %v325_v9 = vld [vmem:[%s1338_s0] sm:$0xff]  ;;  %v336_v10 = vcombine.high %v328_v6, %v328_v6  ;;  %v337_v11 = vcombine.high %v329_v7, %v329_v7  ;;  %v664_v16 = vld [vmem:[%s1252_s8 + $0x10] sm:$0xff]  ;;  %v663_v20 = vld [vmem:[%s1252_s8 + $0x8] sm:$0xff]  ;;  %s725_s10 = sshll.u32 %s297_s27, 4  ;;  %s1296_s6 = scalar_lea.hbm %s1342_s4, %s889_s25  ;;  %s726_s10 = int_to_ptr.vmem [resolvable:$true] %s725_s10 }
  0x3e   : > { %681 = vperm.xlu0 %959, %v678_v8   ;;  %870 = vmatprep.subr.msk.mxu0 %vm342_vm0, %v334_v4  ;;  %v662_v15 = vld [vmem:[%s1252_s8] sm:$0xff]  ;;  %v665_v22 = vld [vmem:[%s1252_s8 + $0x18] sm:$0xff]  ;;  %v668_v30 = vld [vmem:[%s1252_s8 + $0x30] sm:$0xff]  ;;  %s709_s18 = scalar_lea.sflag [#allocation5], %s1246_s5  ;;  %s1020_s7 = scalar_lea.vmem %s726_s10, 1024 }
  0x3f   : > { %873 = vmatprep.subr.msk.mxu1 %vm342_vm0, %v335_v5  ;;  %871 = vmatpush1.msk.msra.mxu0 %vm342_vm0, %v326_v2  ;;  %v666_v28 = vld [vmem:[%s1252_s8 + $0x20] sm:$0xff]  ;;  %v667_v36 = vld [vmem:[%s1252_s8 + $0x28] sm:$0xff]  ;;  %v669_v38 = vld [vmem:[%s1252_s8 + $0x38] sm:$0xff]  ;;  %p1021_p8 = scmp.ne.s32.totalorder %s726_s10, %s1020_s7  ;;  %s1110_s8 = smov [#allocation8]  }
  0x40   : > { %874 = vmatpush1.msk.msra.mxu1 %vm342_vm0, %v327_v3  ;;  %872 = vmatmul.mubr.msk.f32.vlgmr.msra.gmra.mxu0 %vm338_vm1, %v325_v9  ;;  %s1024_s13 = sshll.u32 %s1110_s8, 4  ;;  %s1025_s13 = int_to_ptr.vmem [resolvable:$false] %s1024_s13 }
  0x41   : > { %875 = vmatmul.mubr.msk.f32.vlgmr.msra.gmra.mxu1 %vm338_vm1, %v325_v9  ;;  %876 = vmatprep.subr.msk.mxu0 %vm342_vm0, %v336_v10  ;;  %p1022_p0 = pnand %p1021_p8, %p1187_p9  ;;  %s1026_s26 = scalar_lea.vmem %s1025_s13, 2048 }
  0x42   : > { %879 = vmatprep.subr.msk.mxu1 %vm342_vm0, %v337_v11  ;;  %877 = vmatpush1.msk.msra.mxu0 %vm342_vm0, %v328_v6  ;;  %p1027_p13 = scmp.lt.s32.totalorder %s726_s10, %s1025_s13  ;;  %p1028_p5 = scmp.lt.s32.totalorder %s1026_s26, %s1020_s7 }
  0x43   : > { %880 = vmatpush1.msk.msra.mxu1 %vm342_vm0, %v329_v7  ;;  %565 = vmatprep.mubr.f32.mxu0 %v1108_v0  ;;  %p1023_p3 = pneg %p1022_p0 }
  0x44   : > { %636 = vmatprep.mubr.f32.mxu1 %v1108_v0  ;;  %878 = vmatmul.mubr.msk.f32.vlgmr.msra.gmra.mxu0 %vm338_vm1, %v325_v9  ;;  %p1029_p12 = por %p1028_p5, %p1027_p13 }
  0x45   : > { %881 = vmatmul.mubr.msk.f32.vlgmr.msra.gmra.mxu1 %vm338_vm1, %v325_v9 }
  0x46   : > { %p1030_p6 = pnand %p1029_p12, %p1023_p3 }
  0xb9   : > { %v682_v12 = vpop.permute.xlu0 %681 }
 0x100   : > { %v425_v13 = vpop.f32.mrf.mxu0 }
 0x101   : > { %v496_v14 = vpop.f32.mrf.mxu1  ;;  %v684_v17 = vadd.f32 %v682_v12, %v425_v13 }
 0x102   : > { %v686_v18 = vadd.f32 %v682_v12, %v496_v14  ;;  %v427_v19 = vpop.f32.mrf.mxu0 }
 0x103   : > { %v498_v21 = vpop.f32.mrf.mxu1  ;;  %v692_v23 = vadd.f32 %v684_v17, %v662_v15  ;;  %v685_v25 = vadd.f32 %v682_v12, %v427_v19 }
 0x104   : > { %v694_v24 = vadd.f32 %v686_v18, %v664_v16  ;;  %v687_v26 = vadd.f32 %v682_v12, %v498_v21  ;;  %v567_v27 = vpop.f32.mrf.mxu0 }
 0x105   : > { %v638_v29 = vpop.f32.mrf.mxu1  ;;  %700 = vst [vmem:[%s297_s27] sm:$0xff] %v692_v23  ;;  %v693_v31 = vadd.f32 %v685_v25, %v663_v20  ;;  %v688_v33 = vadd.f32 %v682_v12, %v567_v27 }
 0x106   : > { %702 = vst [vmem:[%s297_s27 + $0x10] sm:$0xff] %v694_v24  ;;  %v695_v32 = vadd.f32 %v687_v26, %v665_v22  ;;  %v690_v34 = vadd.f32 %v682_v12, %v638_v29  ;;  %v569_v35 = vpop.f32.mrf.mxu0 }
 0x107   : > { %v640_v37 = vpop.f32.mrf.mxu1  ;;  %701 = vst [vmem:[%s297_s27 + $0x8] sm:$0xff] %v693_v31  ;;  %v696_v39 = vadd.f32 %v688_v33, %v666_v28  ;;  %v689_v41 = vadd.f32 %v682_v12, %v569_v35 }
 0x108   : > { %703 = vst [vmem:[%s297_s27 + $0x18] sm:$0xff] %v695_v32  ;;  %v698_v40 = vadd.f32 %v690_v34, %v668_v30  ;;  %v691_v42 = vadd.f32 %v682_v12, %v640_v37 }
 0x109   : > { %704 = vst [vmem:[%s297_s27 + $0x20] sm:$0xff] %v696_v39  ;;  %v697_v43 = vadd.f32 %v689_v41, %v667_v36 }
 0x10a   : > { %706 = vst [vmem:[%s297_s27 + $0x30] sm:$0xff] %v698_v40  ;;  %v699_v44 = vadd.f32 %v691_v42, %v669_v38 }
 0x10b   : > { %705 = vst [vmem:[%s297_s27 + $0x28] sm:$0xff] %v697_v43 }
 0x10c   : > { %707 = vst [vmem:[%s297_s27 + $0x38] sm:$0xff] %v699_v44 }
 0x10d   : > { %1033 = shalt.err (!%p1030_p6)
}
 0x10e   : > { %s1034_s9 = scalar_lea.hbm %s1296_s6, 1024  ;;  %s1038_s21 = scalar_lea.hbm %s1342_s4, 2048 }
 0x10f   : > { %p1035_p7 = scmp.ne.s32.totalorder %s1296_s6, %s1034_s9  ;;  %p1039_p4 = scmp.lt.s32.totalorder %s1296_s6, %s1342_s4 }
 0x110   : > { %p1040_p10 = scmp.lt.s32.totalorder %s1038_s21, %s1034_s9 }
 0x111   : > { %p1036_p1 = pnand %p1035_p7, %p1187_p9 }
 0x112   : > { %p1041_p8 = por %p1040_p10, %p1039_p4 }
 0x113   : > { %p1037_p2 = pneg %p1036_p1 }
 0x115   : > { %p1042_p0 = pnand %p1041_p8, %p1037_p2 }
 0x117   : > { %1045 = shalt.err (!%p1042_p0)
}
 0x118   : > { %894 = dma.vmem_to_hbm [thread:$0]  (%p1187_p9), %s726_s10, 1024, %s1296_s6, %s709_s18  }
 0x119 PF: > { %s737_s27 = sand.u32 1, %s1084_s15   ;;  %p1349_p3 = scmp.ge.s32.totalorder %s1104_s20, 2 }
 0x11a   : > { %s738_s25 = scalar_lea.sflag [#allocation5], %s737_s27 }
 0x11b   : > { %p904_p13 = pnand %p1349_p3, %p1194_p11 }
 0x11d   : > { %p905_p5 = pneg %p904_p13 }
 0x11f   : > { %1079 = dma.done.wait (%p905_p5), %s738_s25, 1024  }
 0x120   : > { %1081 = vsyncadd (%p905_p5), %s738_s25, 4294966272  ;;  %s23_s20 = sadd.s32 1, %s1104_s20   ;;  %s1350_s15 = smov %s1088_s16 }
 0x121   : > { %p20_p12 = scmp.ge.s32.totalorder %s23_s20, 4   ;;  %s1351_s16 = smov %s1092_s17 }
 0x122   : > { %s1352_s17 = smov %s1192_s29  ;;  %s1353_s18 = smov %s1100_s19 }
 0x123   : > { %s1354_s19 = smov %s1356_s23  ;;  %22 = sbr.rel (!%p20_p12) target bundleno = 8 (0x8), region = 105 }
 0x128   :  { %743 = vsyncpa [#allocation4], 1 }
 0x129   :  { %745 = vsyncpa [#allocation4 + $0x1], 1 }
 0x12a   :  { %746 = vsyncpa [#allocation7], 1 }
 0x12b   :  { %748 = vsyncpa [#allocation7 + $0x1], 1 }
 0x12c   :  { %749 = vsyncpa [#allocation5], 1 }
 0x12d   :  { %751 = vsyncpa [#allocation5 + $0x1], 1 }

</bundles_post_ra>
